<compile_context>
chip_gen: v7x
topology: tpu7x:2x2x1
jax: 0.10.0
libtpu: 0.0.40
codegen_flags: <defaults>
</compile_context>

<pallas_src>
import functools

import jax
import jax.numpy as jnp
from jax.experimental import pallas as pl
from jax.experimental.pallas import tpu as pltpu

BN_EPS = 1e-5
_LANE = 128
_MIB = 1024 * 1024


def _vmem_capacity_bytes():
    """Physical per-core VMEM; conservative 64 MiB (v7x) fallback if unknown."""
    try:
        cap = getattr(pltpu.get_tpu_info(), "vmem_capacity_bytes", None)
        if cap:
            return int(cap)
    except Exception:
        pass
    return 64 * _MIB


def _budgets():
    """(double-buffer budget bytes, vmem_limit clamp bytes) by chip VMEM size."""
    cap = _vmem_capacity_bytes()
    if cap >= 100 * _MIB:              # v5e / v6e: 128 MiB physical VMEM
        return 48 * _MIB, 96 * _MIB
    return 24 * _MIB, 40 * _MIB        # v7x: 64 MiB per TensorCore


def _pick_lane_tile(rows, hw, itemsize, buf_budget, cap_lanes):
    """Largest lane-aligned HW tile of a (rows, hw) slab whose double-buffered
    block fits `buf_budget` bytes.  For hw < 128 returns hw itself (a single
    full-extent block, which is always a legal block shape)."""
    lane_floor = (hw // _LANE) * _LANE
    if lane_floor == 0:
        return hw
    max_tile = (buf_budget // (2 * max(rows, 1) * itemsize)) // _LANE * _LANE
    max_tile = max(_LANE, max_tile)
    return int(min(max_tile, cap_lanes, lane_floor))


def _pool_kernel(hw, num_k, x_ref, o_ref, acc_ref):
    # x_ref:   (1, Cb, HW_TILE)  one spatial tile of one image's channel slice
    # o_ref:   (1, Cb, 1) f32    per-channel mean over (H, W)
    # acc_ref: (Cb, 128) f32     running partial sums (128-lane VPU adds)
    cb = x_ref.shape[1]
    hw_tile = x_ref.shape[2]
    inv_hw = 1.0 / float(hw)

    if hw_tile % _LANE != 0:
        # Tiny-spatial path: single full-extent block (num_k == 1), no tiling.
        o_ref[0] = (jnp.sum(x_ref[0].astype(jnp.float32), axis=-1, keepdims=True)
                    * inv_hw)
        return

    k = pl.program_id(2)

    @pl.when(k == 0)
    def _():
        acc_ref[...] = jnp.zeros_like(acc_ref)

    def accumulate(base, limit):
        # `base`/`limit` are Python ints -> all masks are compile-time static.
        acc = acc_ref[...]
        for c in range(hw_tile // _LANE):
            start = base + c * _LANE
            if start >= limit:
                break                              # chunk fully past the tail: skip
            chunk = x_ref[0, :, c * _LANE:(c + 1) * _LANE].astype(jnp.float32)
            if start + _LANE > limit:              # straddles the HW tail: mask it
                lane = jax.lax.broadcasted_iota(jnp.int32, (cb, _LANE), 1)
                chunk = jnp.where(start + lane < limit, chunk, 0.0)
            acc = acc + chunk
        acc_ref[...] = acc

    def finalize():
        # One small cross-lane reduce per (image, channel slice).
        o_ref[0] = jnp.sum(acc_ref[...], axis=-1, keepdims=True) * inv_hw

    last = num_k - 1
    if num_k == 1:
        accumulate(0, hw)                          # hw == hw_tile: no masking
        finalize()
    elif hw % hw_tile == 0:
        accumulate(0, hw_tile)

        @pl.when(k == last)
        def _():
            finalize()
    else:
        @pl.when(k != last)
        def _():
            accumulate(0, hw_tile)

        @pl.when(k == last)
        def _():
            accumulate(last * hw_tile, hw)         # in-kernel tail mask (no host pad)
            finalize()


def _broadcast_kernel(y_ref, o_ref):
    # y_ref: (1, Cout, 1) f32;  o_ref: (1, Cout, HW_TILE) output dtype.
    # Bilinear upsample of a 1x1 map with align_corners=True == constant bcast.
    cout, hw_tile = o_ref.shape[1], o_ref.shape[2]
    o_ref[0] = jnp.broadcast_to(y_ref[0], (cout, hw_tile)).astype(o_ref.dtype)


def aspp_pooling(x_nchw, conv_w, conv_b, bn_gamma, bn_beta, bn_mean, bn_var):
    """x_nchw: (N, Cin, H, W). conv_w: (Cout, Cin, 1, 1). Returns (N, Cout, H, W)."""
    n, cin, h, w = x_nchw.shape
    cout = conv_w.shape[0]
    hw = h * w
    out_dtype = x_nchw.dtype
    x_itemsize = jnp.dtype(x_nchw.dtype).itemsize
    out_itemsize = jnp.dtype(out_dtype).itemsize

    buf_budget, vmem_clamp = _budgets()

    # Split the channel axis across a second "parallel" grid dim so both
    # TensorCores on dual-core parts (v7x) have work when N == 1.
    n_split = 2 if (n == 1 and cin % 16 == 0 and hw >= _LANE) else 1
    cin_b = cin // n_split

    # ---- Pass 1: global average pool -> (N, Cin, 1) f32 ----------------------
    hw_tile = _pick_lane_tile(cin_b, hw, x_itemsize, buf_budget, 8192)
    num_k = pl.cdiv(hw, hw_tile)

    x_flat = x_nchw.reshape(n, cin, hw)   # no host pad: tail masked in-kernel

    vmem1 = (2 * cin_b * hw_tile * x_itemsize    # double-buffered input block
             + 2 * cin_b * 4                     # output block
             + cin_b * _LANE * 4                 # accumulator scratch
             + 2 * _MIB)                         # margin
    vmem1 = int(min(max(vmem1, 4 * _MIB), vmem_clamp))

    pooled = pl.pallas_call(
        functools.partial(_pool_kernel, hw, num_k),
        out_shape=jax.ShapeDtypeStruct((n, cin, 1), jnp.float32),
        grid_spec=pltpu.PrefetchScalarGridSpec(
            num_scalar_prefetch=0,
            grid=(n, n_split, num_k),
            in_specs=[pl.BlockSpec((1, cin_b, hw_tile), lambda i, s, k: (i, s, k))],
            out_specs=pl.BlockSpec((1, cin_b, 1), lambda i, s, k: (i, s, 0)),
            scratch_shapes=[pltpu.VMEM((cin_b, _LANE), jnp.float32)],
        ),
        compiler_params=pltpu.CompilerParams(
            dimension_semantics=("parallel", "parallel", "arbitrary"),
            vmem_limit_bytes=vmem1),
    )(x_flat)

    # ---- 1x1 conv + eval-mode BatchNorm (folded) + ReLU on the tiny pooled
    #      vector, in plain JAX (O(N*Cin*Cout) flops -> noise; keeps the conv
    #      weight out of Pass-1 VMEM).
    scale = bn_gamma.astype(jnp.float32) * jax.lax.rsqrt(
        bn_var.astype(jnp.float32) + BN_EPS)                             # (Cout,)
    w_folded = conv_w[:, :, 0, 0].astype(jnp.float32) * scale[:, None]   # (Cout, Cin)
    if conv_b is None:
        conv_b = jnp.zeros((cout,), jnp.float32)
    b_folded = ((conv_b.astype(jnp.float32) - bn_mean.astype(jnp.float32)) * scale
                + bn_beta.astype(jnp.float32))                           # (Cout,)

    y = pooled[:, :, 0] @ w_folded.T + b_folded                          # (N, Cout)
    y = jnp.maximum(y, 0.0)[:, :, None].astype(jnp.float32)              # (N, Cout, 1)

    # ---- Pass 2: constant broadcast back to (N, Cout, H*W) -------------------
    # Independent (bigger) tile; exact out_shape -> partial edge block is
    # masked on store by Pallas, no padded output, no post-slice copy.
    hw_tile2 = _pick_lane_tile(cout, hw, out_itemsize, buf_budget, 16384)
    num_k2 = pl.cdiv(hw, hw_tile2)

    vmem2 = 2 * cout * hw_tile2 * out_itemsize + 2 * cout * 4 + 2 * _MIB
    vmem2 = int(min(max(vmem2, 4 * _MIB), vmem_clamp))

    out = pl.pallas_call(
        _broadcast_kernel,
        out_shape=jax.ShapeDtypeStruct((n, cout, hw), out_dtype),
        grid_spec=pltpu.PrefetchScalarGridSpec(
            num_scalar_prefetch=0,
            grid=(n, num_k2),
            in_specs=[pl.BlockSpec((1, cout, 1), lambda i, k: (i, 0, 0))],
            out_specs=pl.BlockSpec((1, cout, hw_tile2), lambda i, k: (i, 0, k)),
        ),
        compiler_params=pltpu.CompilerParams(
            dimension_semantics=("parallel", "parallel"),
            vmem_limit_bytes=vmem2),
    )(y)

    return out.reshape(n, cout, h, w)


def aspp_pooling_ref(x, conv_w, conv_b, g, b, m, v):
    """Plain-JAX reference (mirrors the PyTorch forward in eval mode)."""
    n, cin, h, w = x.shape
    pooled = jnp.mean(x.astype(jnp.float32), axis=(2, 3))          # (N, Cin)
    y = pooled @ conv_w[:, :, 0, 0].astype(jnp.float32).T + conv_b
    y = (y - m) / jnp.sqrt(v + BN_EPS) * g + b
    y = jnp.maximum(y, 0.0)
    out = jnp.broadcast_to(y[:, :, None, None], (n, y.shape[1], h, w))
    return out.astype(x.dtype)


if __name__ == "__main__":
    key = jax.random.PRNGKey(0)

    def make_params(cin, cout, keys):
        k_w, k_b, k_g, k_be, k_m, k_v = keys
        conv_w = jax.random.normal(k_w, (cout, cin, 1, 1), jnp.float32) * 0.1
        conv_b = jax.random.normal(k_b, (cout,), jnp.float32) * 0.1
        g = 1.0 + 0.1 * jax.random.normal(k_g, (cout,), jnp.float32)
        be = 0.1 * jax.random.normal(k_be, (cout,), jnp.float32)
        m = 0.1 * jax.random.normal(k_m, (cout,), jnp.float32)
        v = 0.5 + jnp.abs(jax.random.normal(k_v, (cout,), jnp.float32))
        return conv_w, conv_b, g, be, m, v

    configs = [
        # (N, Cin, Cout, H, W, dtype, tol)
        (2, 4, 8, 16, 16, jnp.float32, 1e-5),      # primary small config
        (1, 32, 16, 13, 11, jnp.bfloat16, 1e-2),   # non-lane-aligned HW tail + split
        (2, 8, 4, 5, 5, jnp.float32, 1e-5),        # tiny spatial (HW < 128)
    ]

    for idx, (n, cin, cout, h, w, dtype, tol) in enumerate(configs):
        keys = jax.random.split(jax.random.fold_in(key, idx), 7)
        x = jax.random.normal(keys[0], (n, cin, h, w), jnp.float32).astype(dtype)
        params = make_params(cin, cout, tuple(keys[1:]))

        out = aspp_pooling(x, *params)
        out = jax.block_until_ready(out)

        ref = aspp_pooling_ref(x, *params)
        assert out.shape == (n, cout, h, w)
        assert jnp.allclose(out.astype(jnp.float32), ref.astype(jnp.float32),
                            atol=tol, rtol=tol), f"mismatch vs reference, config {idx}"

    print("KERNEL_OK")
</pallas_src>

<mosaic_0001>
module attributes {stable_mosaic.version = 11 : i64} {
  func.func @_pool_kernel(%arg0: i32, %arg1: i32, %arg2: i32, %arg3: memref<1x4x256xf32, #tpu.memory_space<vmem>>, %arg4: memref<1x4x1xf32, #tpu.memory_space<vmem>>, %arg5: memref<4x128xf32, #tpu.memory_space<vmem>>) attributes {dimension_semantics = [#tpu.dimension_semantics<parallel>, #tpu.dimension_semantics<parallel>, #tpu.dimension_semantics<arbitrary>], iteration_bounds = array<i64: 2, 1, 1>, scalar_prefetch = 0 : i64, scratch_operands = 1 : i64, tpu.core_type = #tpu.core_type<tc>, window_params = [{transform_indices = @transform_0, window_bounds = array<i64: 1, 4, 256>}, {transform_indices = @transform_1, window_bounds = array<i64: 1, 4, 1>}]} {
    %c0_i32 = arith.constant 0 : i32
    %0 = arith.cmpi eq, %arg2, %c0_i32 : i32
    %1 = arith.extui %0 : i1 to i32
    %c0_i32_0 = arith.constant 0 : i32
    %2 = arith.cmpi ne, %1, %c0_i32_0 : i32
    scf.if %2 {
      %cst_15 = arith.constant 0.000000e+00 : f32
      %19 = vector.broadcast %cst_15 : f32 to vector<4x128xf32>
      %c0_16 = arith.constant 0 : index
      %c0_17 = arith.constant 0 : index
      %20 = vector.load %arg5[%c0_16, %c0_17] : memref<4x128xf32, #tpu.memory_space<vmem>>, vector<4x128xf32>
      tpu.vector_store %arg5[%c0_16, %c0_17], %19 {strides = array<i32>} : memref<4x128xf32, #tpu.memory_space<vmem>>, vector<4x128xf32>,
    } else {
    }
    %c0 = arith.constant 0 : index
    %c0_1 = arith.constant 0 : index
    %3 = vector.load %arg5[%c0, %c0_1] : memref<4x128xf32, #tpu.memory_space<vmem>>, vector<4x128xf32>
    %c0_2 = arith.constant 0 : index
    %c0_3 = arith.constant 0 : index
    %c0_4 = arith.constant 0 : index
    %4 = vector.load %arg3[%c0_2, %c0_3, %c0_4] : memref<1x4x256xf32, #tpu.memory_space<vmem>>, vector<1x4x128xf32>
    %5 = vector.shape_cast %4 : vector<1x4x128xf32> to vector<4x128xf32>
    %6 = arith.addf %3, %5 : vector<4x128xf32>
    %c0_5 = arith.constant 0 : index
    %c0_6 = arith.constant 0 : index
    %c128 = arith.constant 128 : index
    %7 = vector.load %arg3[%c0_5, %c0_6, %c128] : memref<1x4x256xf32, #tpu.memory_space<vmem>>, vector<1x4x128xf32>
    %8 = vector.shape_cast %7 : vector<1x4x128xf32> to vector<4x128xf32>
    %9 = arith.addf %6, %8 : vector<4x128xf32>
    %c0_7 = arith.constant 0 : index
    %c0_8 = arith.constant 0 : index
    %10 = vector.load %arg5[%c0_7, %c0_8] : memref<4x128xf32, #tpu.memory_space<vmem>>, vector<4x128xf32>
    tpu.vector_store %arg5[%c0_7, %c0_8], %9 {strides = array<i32>} : memref<4x128xf32, #tpu.memory_space<vmem>>, vector<4x128xf32>,
    %c0_9 = arith.constant 0 : index
    %c0_10 = arith.constant 0 : index
    %11 = vector.load %arg5[%c0_9, %c0_10] : memref<4x128xf32, #tpu.memory_space<vmem>>, vector<4x128xf32>
    %cst = arith.constant dense<0.000000e+00> : vector<4xf32>
    %12 = vector.multi_reduction <add>, %11, %cst [1] : vector<4x128xf32> to vector<4xf32>
    %13 = vector.shape_cast %12 : vector<4xf32> to vector<4x1xf32>
    %cst_11 = arith.constant 3.906250e-03 : f32
    %14 = vector.broadcast %cst_11 : f32 to vector<4x1xf32>
    %15 = arith.mulf %13, %14 : vector<4x1xf32>
    %c0_12 = arith.constant 0 : index
    %c0_13 = arith.constant 0 : index
    %c0_14 = arith.constant 0 : index
    %16 = vector.load %arg4[%c0_12, %c0_13, %c0_14] : memref<1x4x1xf32, #tpu.memory_space<vmem>>, vector<1x4x1xf32>
    %17 = vector.shape_cast %16 : vector<1x4x1xf32> to vector<4x1xf32>
    %18 = vector.shape_cast %15 : vector<4x1xf32> to vector<1x4x1xf32>
    tpu.vector_store %arg4[%c0_12, %c0_13, %c0_14], %18 {strides = array<i32>} : memref<1x4x1xf32, #tpu.memory_space<vmem>>, vector<1x4x1xf32>,
    return
  }
  func.func @transform_0(%arg0: i32, %arg1: i32, %arg2: i32) -> (i32, i32, i32) {
    %c0_i32 = arith.constant 0 : i32
    return %arg0, %arg1, %arg2 : i32, i32, i32
  }
  func.func @transform_1(%arg0: i32, %arg1: i32, %arg2: i32) -> (i32, i32, i32) {
    %c0_i32 = arith.constant 0 : i32
    %c0_i32_0 = arith.constant 0 : i32
    return %arg0, %arg1, %c0_i32 : i32, i32, i32
  }
}

</mosaic_0001>

<bundles_post_ra>
// kernel: tpu_custom_call.1
= control target key start
LH: loop header
LB: loop body
LE: loop exit
PB: predicated region body
PF: predicated region fallthrough
CT: control target
= control target key end

     0   :  { %6 = vsyncpa [#allocation4], 0  ;;  %s567_s0 = inlined_call_operand.hbm [shape: f32[2,4,256], index: 0, kind: input, shape index: {}]   ;;  %s568_s1 = inlined_call_operand.vmem [shape: f32[2,4,1], index: 1, kind: output, shape index: {}]  }
   0x1   :  { %8 = vsyncpa [#allocation4 + $0x1], 0  ;;  %s442_s6 = smov 0   ;;  %s444_s7 = smov 0  }
   0x2   :  { %s446_s8 = smov 0   ;;  %s448_s9 = smov 0  }
   0x3   :  { %s450_s10 = smov 0   ;;  %s452_s11 = smov 0  }
   0x4 LB: > { %s279_s12 = sadd.s32 4294967295, %s428_s11   ;;  %s33_s13 = sadd.s32 1, %s424_s10  ;;  %s428_s11 = sphi %s452_s11, %s14_s11   ;;  %s424_s10 = sphi %s450_s10, %s578_s10   ;;  %s420_s9 = sphi %s448_s9, %s577_s9   ;;  %s416_s8 = sphi %s446_s8, %s576_s8   ;;  %s412_s7 = sphi %s444_s7, %s575_s7   ;;  %s408_s6 = sphi %s442_s6, %s574_s6  }
   0x5   : > { %p35_p0 = scmp.ge.s32.totalorder %s33_s13, 2  ;;  %s44_s14 = sadd.s32 1, %s416_s8 }
   0x6   : > { %p51_p1 = scmp.ne.s32.totalorder %s416_s8, %s412_s7  ;;  %p52_p2 = scmp.eq.s32.totalorder %s428_s11, 0 }
   0x7   : > { %s580_s13 = smov (%p35_p0, %s33_s13), 0  ;;  %p57_p4 = scmp.ne.s32.totalorder %s412_s7, %s408_s6 }
   0x8   : > { %p478_p3 = por %p52_p2, %p51_p1  ;;  %s37_s16 = ssub.s32 %s424_s10, %s580_s13 }
   0x9   : > { %p58_p5 = scmp.eq.s32.totalorder %s279_s12, 0  ;;  %p42_p6 = scmp.eq.s32.totalorder %s37_s16, 0 }
   0xa   : > { %p298_p8 = scmp.lt.s32.totalorder %s428_s11, 2  ;;  %s109_s19 = sand.u32 1, %s416_s8  }
   0xb   : > { %p485_p7 = por %p58_p5, %p57_p4  ;;  %s291_s20 = sshll.u32 %s424_s10, 7 }
   0xc   : > { %s491_s18 = scalar_select %p42_p6, %s416_s8, %s44_s14  }
   0xd   : > { %s283_s21 = sshll.u32 %s109_s19, 3  ;;  %s498_s24 = scalar_lea.hbm %s567_s0, %s291_s20 }
   0xe   : > { %s113_s25 = scalar_lea.vmem [#allocation3], %s283_s21  ;;  %p502_p9 = pnand %p298_p8, %p478_p3 }
   0xf   : > { %s125_s26 = sshll.u32 %s113_s25, 4  ;;  %s110_s28 = scalar_lea.sflag [#allocation4], %s109_s19  ;;  %s506_s26 = int_to_ptr.vmem [resolvable:$true] %s125_s26 }
  0x10   : > { %s348_s29 = scalar_lea.hbm %s498_s24, 128  ;;  %p350_p13 = pneg %p502_p9 }
  0x11   : > { %p349_p12 = scmp.ne.s32.totalorder %s498_s24, %s348_s29  ;;  %s353_s3 = scalar_lea.hbm %s567_s0, 256 }
  0x12   : > { %p354_p2 = scmp.lt.u32.totalorder %s498_s24, %s567_s0  ;;  %p355_p3 = scmp.lt.u32.totalorder %s353_s3, %s348_s29 }
  0x13   : > { %p351_p0 = pnand %p350_p13, %p349_p12  ;;  %p357_p5 = scmp.lt.u32.totalorder %s348_s29, %s498_s24 }
  0x14   : > { %p356_p4 = por %p355_p3, %p354_p2 }
  0x15   : > { %p352_p1 = pneg %p351_p0 }
  0x16   : > { %p358_p6 = por %p357_p5, %p356_p4 }
  0x18   : > { %p359_p8 = pnand %p358_p6, %p352_p1 }
  0x1a   : > { %362 = shalt.err (!%p359_p8)
}
  0x1b   : > { %s363_s6 = scalar_lea.vmem %s506_s26, 128  ;;  %s430_s12 = smov [#allocation3]  }
  0x1c   : > { %p364_p12 = scmp.ne.s32.totalorder %s506_s26, %s363_s6  ;;  %s368_s14 = sshll.u32 %s430_s12, 4  ;;  %s369_s14 = int_to_ptr.vmem [resolvable:$false] %s368_s14 }
  0x1d   : > { %s370_s15 = scalar_lea.vmem %s369_s14, 256  ;;  %p371_p11 = scmp.lt.s32.totalorder %s506_s26, %s369_s14 }
  0x1e   : > { %p366_p0 = pnand %p364_p12, %p350_p13  ;;  %p372_p2 = scmp.lt.s32.totalorder %s370_s15, %s363_s6 }
  0x20   : > { %p367_p10 = pneg %p366_p0  ;;  %p373_p3 = por %p372_p2, %p371_p11 }
  0x22   : > { %p374_p4 = pnand %p373_p3, %p367_p10 }
  0x24   : > { %377 = shalt.err (!%p374_p4)
}
  0x25   : > { %297 = dma.hbm_to_vmem [thread:$0]  (!%p502_p9), %s498_s24, 128, %s506_s26, %s110_s28  }
  0x26   : > { %p572_p1 = scmp.lt.s32.totalorder %s428_s11, 3  ;;  %p573_p5 = scmp.ge.s32.totalorder %s428_s11, 1 }
  0x28   : > { %p131_p13 = pnand %p573_p5, %p572_p1 }
  0x29   : > { %s136_s16 = sand.u32 (!%p131_p13), 1, %s412_s7  }
  0x2a   : > { %134 = sbr.rel (%p131_p13) target bundleno = 217 (0xd9), region = 24  ;;  %s287_s19 = sshll.u32 (!%p131_p13), %s136_s16, 3 }
  0x2b   : > { %s137_s20 = scalar_lea.sflag (!%p131_p13), [#allocation4], %s136_s16  ;;  %s140_s21 = scalar_lea.vmem (!%p131_p13), [#allocation3], %s287_s19 }
  0x31   : > { %403 = dma.done.wait (%p485_p7), %s137_s20, 128  }
  0x32   : > { %405 = vsyncadd (%p485_p7), %s137_s20, 4294967168  ;;  %v431_v0 = vmov 0.0   ;;  %v175_v1 = vld [vmem:[%s140_s21] sm:$0xf]  ;;  %v177_v3 = vld [vmem:[%s140_s21 + $0x4] sm:$0xf] }
  0x33   : > { %173 = vst [vmem:[#allocation2] sm:$0xf] %v431_v0  ;;  %vm181_vm0 = vcmask 1043456   ;;  %p162_p9 = scmp.lt.s32.totalorder %s420_s9, 1  ;;  %vm186_vm1 = vcmask 3072  }
  0x35   : > { %s582_s9 = smov (!%p162_p9, %s420_s9), 1 }
  0x36   : > { %s288_s22 = sshll.u32 %s582_s9, 2 }
  0x37   : > { %s168_s24 = scalar_lea.vmem %s568_s1, %s288_s22 }
  0x3a   : > { %v174_v2 = vld [vmem:[#allocation2] sm:$0xf] }
  0x3b   : > { %v176_v4 = vadd.f32 %v175_v1, %v174_v2 }
  0x3d   : > { %v178_v5 = vadd.f32 %v177_v3, %v176_v4 }
  0x3f   : > { %179 = vst [vmem:[#allocation2] sm:$0xf] %v178_v5 }
  0x46   : > { %v180_v6 = vld [vmem:[#allocation2] sm:$0xf] }
  0x47   : > { %v182_v7 = vsel %vm181_vm0, %v180_v6, 0.0 }
  0x48   : > { %183 = vadd.xlane.f32.xlu0 %v182_v7 }
  0xd5   : > { %v184_v8 = vpop.xlane.xlu0 %183 }
  0xd6   : > { %v185_v9 = vmul.f32 0.00390625, %v184_v8 }
  0xd8   : > { %187 = vst.msk [vmem:[%s168_s24] sm:$0xf] %vm186_vm1, %v185_v9 }
  0xd9 PF: > { %s14_s11 = sadd.s32 1, %s428_s11   ;;  %s574_s6 = smov %s412_s7 }
  0xda   : > { %p11_p7 = scmp.ge.s32.totalorder %s14_s11, 4   ;;  %s575_s7 = smov %s416_s8 }
  0xdb   : > { %s576_s8 = smov %s491_s18  ;;  %s577_s9 = smov %s424_s10 }
  0xdc   : > { %s578_s10 = smov %s580_s13  ;;  %13 = sbr.rel (!%p11_p7) target bundleno = 4 (0x4), region = 68 }
  0xe3   :  { %213 = vsyncpa [#allocation4], 1 }
  0xe4   :  { %215 = vsyncpa [#allocation4 + $0x1], 1 }

</bundles_post_ra>
